<compile_context>
chip_gen: v5e
topology: v5e:2x2
jax: 0.10.0
libtpu: 0.0.40
codegen_flags: <defaults>
</compile_context>

<pallas_src>
import functools

import jax
import jax.numpy as jnp
from jax import lax
from jax.experimental import pallas as pl
from jax.experimental.pallas import tpu as pltpu


def _round_up(x, m):
    return ((x + m - 1) // m) * m


def mdn_kernel(y_ref, wh_ref, bh_ref, whd_ref, bhd_ref, out_ref, *, k, kd):
    y = y_ref[...]

    # hidden layer + ReLU
    h = jnp.dot(y, wh_ref[...], preferred_element_type=jnp.float32) + bh_ref[...]
    h = jnp.maximum(h, 0.0)

    # single fused head matmul -> lane-dense (TB, P) slab
    heads = jnp.dot(h, whd_ref[...], preferred_element_type=jnp.float32) + bhd_ref[...]

    tb, p = heads.shape
    col = lax.broadcasted_iota(jnp.int32, (tb, p), 1)
    is_pi = col < k
    is_sigma = jnp.logical_and(col >= k, col < k + kd)
    # columns in [k+kd, k+2*kd) are mu; columns >= k+2*kd are zero padding.

    # pi: softmax restricted to the real K logit columns
    m = jnp.max(jnp.where(is_pi, heads, -jnp.inf), axis=1, keepdims=True)
    e = jnp.exp(heads - m)
    denom = jnp.sum(jnp.where(is_pi, e, 0.0), axis=1, keepdims=True)
    pi_vals = e * pl.reciprocal(denom, approx=True)

    # sigma: exp of linear output
    sig_vals = jnp.exp(heads)

    # mu (and pad cols): identity.  One full-width unmasked store.
    out_ref[...] = jnp.where(is_pi, pi_vals, jnp.where(is_sigma, sig_vals, heads))


def mdn_forward(y, params, n_gaussians, output_dim, *, tile_batch=512):
    B, input_dim = y.shape
    hidden_dim = params["wh"].shape[1]
    K, D = n_gaussians, output_dim
    KD = K * D
    w_total = K + 2 * KD
    P = _round_up(w_total, 128)  # lane-dense, 128-aligned output slab width

    # Fuse + zero-pad head weights/biases once in the wrapper.
    w_heads = jnp.concatenate([params["wpi"], params["wsig"], params["wmu"]], axis=1)
    w_heads = jnp.pad(w_heads, ((0, 0), (0, P - w_total)))
    b_heads = jnp.concatenate([params["bpi"], params["bsig"], params["bmu"]], axis=1)
    b_heads = jnp.pad(b_heads, ((0, 0), (0, P - w_total)))

    # Batch tiling: TB multiple of 8, pad B up to a multiple of TB.
    TB = min(tile_batch, _round_up(B, 8))
    Bp = _round_up(B, TB)
    if Bp != B:
        y = jnp.pad(y, ((0, Bp - B), (0, 0)))
    grid = (Bp // TB,)

    slab = pl.pallas_call(
        functools.partial(mdn_kernel, k=K, kd=KD),
        out_shape=jax.ShapeDtypeStruct((Bp, P), jnp.float32),
        grid_spec=pltpu.PrefetchScalarGridSpec(
            num_scalar_prefetch=0,
            grid=grid,
            in_specs=[
                pl.BlockSpec((TB, input_dim), lambda i: (i, 0)),        # y (pipelined)
                pl.BlockSpec((input_dim, hidden_dim), lambda i: (0, 0)),  # resident
                pl.BlockSpec((1, hidden_dim), lambda i: (0, 0)),          # resident
                pl.BlockSpec((hidden_dim, P), lambda i: (0, 0)),          # resident
                pl.BlockSpec((1, P), lambda i: (0, 0)),                   # resident
            ],
            out_specs=pl.BlockSpec((TB, P), lambda i: (i, 0)),
        ),
        compiler_params=pltpu.CompilerParams(
            dimension_semantics=("parallel",),
        ),
    )(y, params["wh"], params["bh"], w_heads, b_heads)

    slab = slab[:B]
    pi = slab[:, :K]
    sigma = slab[:, K:K + KD].reshape(-1, K, D)
    mu = slab[:, K + KD:K + 2 * KD].reshape(-1, K, D)
    return pi, sigma, mu


def init_params(key, input_dim, output_dim, n_gaussians, hidden_dim):
    # Deterministic synthetic init. Weights stored as (in, out) = W.T of the
    # PyTorch nn.Linear weight (out, in); biases as (1, out).
    ks = jax.random.split(key, 8)
    K, D = n_gaussians, output_dim

    def lin(kw, kb, fan_in, fan_out):
        bound = 1.0 / jnp.sqrt(fan_in)
        w = jax.random.uniform(kw, (fan_in, fan_out), jnp.float32, -bound, bound)
        b = jax.random.uniform(kb, (1, fan_out), jnp.float32, -bound, bound)
        return w, b

    wh, bh = lin(ks[0], ks[1], input_dim, hidden_dim)
    wpi, bpi = lin(ks[2], ks[3], hidden_dim, K)
    wsig, bsig = lin(ks[4], ks[5], hidden_dim, K * D)
    wmu, bmu = lin(ks[6], ks[7], hidden_dim, K * D)
    return {
        "wh": wh, "bh": bh,
        "wpi": wpi, "bpi": bpi,
        "wsig": wsig, "bsig": bsig,
        "wmu": wmu, "bmu": bmu,
    }


def mdn_reference(y, params, n_gaussians, output_dim):
    # Pure-JAX reference matching the PyTorch forward.
    h = jnp.maximum(y @ params["wh"] + params["bh"], 0.0)
    pi = jax.nn.softmax(h @ params["wpi"] + params["bpi"], axis=1)
    sigma = jnp.exp(h @ params["wsig"] + params["bsig"]).reshape(-1, n_gaussians, output_dim)
    mu = (h @ params["wmu"] + params["bmu"]).reshape(-1, n_gaussians, output_dim)
    return pi, sigma, mu


if __name__ == "__main__":
    input_dim, output_dim, n_gaussians, hidden_dim = 16, 4, 8, 32
    batch = 2

    key = jax.random.PRNGKey(0)
    k_x, k_p = jax.random.split(key)
    y = jax.random.normal(k_x, (batch, input_dim), jnp.float32)
    params = init_params(k_p, input_dim, output_dim, n_gaussians, hidden_dim)

    pi, sigma, mu = mdn_forward(y, params, n_gaussians, output_dim)
    jax.block_until_ready((pi, sigma, mu))

    pi_r, sigma_r, mu_r = mdn_reference(y, params, n_gaussians, output_dim)
    assert pi.shape == (batch, n_gaussians)
    assert sigma.shape == (batch, n_gaussians, output_dim)
    assert mu.shape == (batch, n_gaussians, output_dim)
    # pi uses the approx EUP reciprocal -> slightly looser tolerance.
    assert jnp.allclose(pi, pi_r, atol=2e-3, rtol=2e-3)
    assert jnp.allclose(sigma, sigma_r, atol=1e-4, rtol=1e-4)
    assert jnp.allclose(mu, mu_r, atol=1e-4, rtol=1e-4)

    print("KERNEL_OK")
</pallas_src>

<mosaic_0001>
module attributes {stable_mosaic.version = 11 : i64} {
  func.func @mdn_kernel(%arg0: i32, %arg1: memref<8x16xf32, #tpu.memory_space<vmem>>, %arg2: memref<16x32xf32, #tpu.memory_space<vmem>>, %arg3: memref<1x32xf32, #tpu.memory_space<vmem>>, %arg4: memref<32x128xf32, #tpu.memory_space<vmem>>, %arg5: memref<1x128xf32, #tpu.memory_space<vmem>>, %arg6: memref<8x128xf32, #tpu.memory_space<vmem>>) attributes {dimension_semantics = [#tpu.dimension_semantics<parallel>], iteration_bounds = array<i64: 1>, scalar_prefetch = 0 : i64, scratch_operands = 0 : i64, tpu.core_type = #tpu.core_type<tc>, window_params = [{transform_indices = @transform_0, window_bounds = array<i64: 8, 16>}, {pipeline_mode = #tpu.pipeline_mode<synchronous>, transform_indices = @transform_1, window_bounds = array<i64: 16, 32>}, {pipeline_mode = #tpu.pipeline_mode<synchronous>, transform_indices = @transform_2, window_bounds = array<i64: 1, 32>}, {pipeline_mode = #tpu.pipeline_mode<synchronous>, transform_indices = @transform_3, window_bounds = array<i64: 32, 128>}, {pipeline_mode = #tpu.pipeline_mode<synchronous>, transform_indices = @transform_4, window_bounds = array<i64: 1, 128>}, {transform_indices = @transform_5, window_bounds = array<i64: 8, 128>}]} {
    %c0 = arith.constant 0 : index
    %c0_0 = arith.constant 0 : index
    %0 = vector.load %arg1[%c0, %c0_0] : memref<8x16xf32, #tpu.memory_space<vmem>>, vector<8x16xf32>
    %c0_1 = arith.constant 0 : index
    %c0_2 = arith.constant 0 : index
    %1 = vector.load %arg2[%c0_1, %c0_2] : memref<16x32xf32, #tpu.memory_space<vmem>>, vector<16x32xf32>
    %cst = arith.constant dense<0.000000e+00> : vector<8x32xf32>
    %2 = tpu.matmul %0, %1, %cst {dimension_numbers = #tpu.dot_dimension_numbers<[1], [0], [0], [1], [0, 0, 1, 1], [], []>} : vector<8x16xf32>, vector<16x32xf32>, vector<8x32xf32> -> vector<8x32xf32>
    %c0_3 = arith.constant 0 : index
    %c0_4 = arith.constant 0 : index
    %3 = vector.load %arg3[%c0_3, %c0_4] : memref<1x32xf32, #tpu.memory_space<vmem>>, vector<1x32xf32>
    %4 = vector.broadcast %3 : vector<1x32xf32> to vector<8x32xf32>
    %5 = arith.addf %2, %4 : vector<8x32xf32>
    %cst_5 = arith.constant 0.000000e+00 : f32
    %6 = vector.broadcast %cst_5 : f32 to vector<8x32xf32>
    %7 = arith.maximumf %5, %6 : vector<8x32xf32>
    %c0_6 = arith.constant 0 : index
    %c0_7 = arith.constant 0 : index
    %8 = vector.load %arg4[%c0_6, %c0_7] : memref<32x128xf32, #tpu.memory_space<vmem>>, vector<32x128xf32>
    %cst_8 = arith.constant dense<0.000000e+00> : vector<8x128xf32>
    %9 = tpu.matmul %7, %8, %cst_8 {dimension_numbers = #tpu.dot_dimension_numbers<[1], [0], [0], [1], [0, 0, 1, 1], [], []>} : vector<8x32xf32>, vector<32x128xf32>, vector<8x128xf32> -> vector<8x128xf32>
    %c0_9 = arith.constant 0 : index
    %c0_10 = arith.constant 0 : index
    %10 = vector.load %arg5[%c0_9, %c0_10] : memref<1x128xf32, #tpu.memory_space<vmem>>, vector<1x128xf32>
    %11 = vector.broadcast %10 : vector<1x128xf32> to vector<8x128xf32>
    %12 = arith.addf %9, %11 : vector<8x128xf32>
    %13 = tpu.iota {dimensions = array<i32: 1>} : vector<8x128xi32>
    %c8_i32 = arith.constant 8 : i32
    %14 = vector.broadcast %c8_i32 : i32 to vector<8x128xi32>
    %15 = arith.cmpi slt, %13, %14 : vector<8x128xi32>
    %c8_i32_11 = arith.constant 8 : i32
    %16 = vector.broadcast %c8_i32_11 : i32 to vector<8x128xi32>
    %17 = arith.cmpi sge, %13, %16 : vector<8x128xi32>
    %c40_i32 = arith.constant 40 : i32
    %18 = vector.broadcast %c40_i32 : i32 to vector<8x128xi32>
    %19 = arith.cmpi slt, %13, %18 : vector<8x128xi32>
    %20 = arith.andi %17, %19 : vector<8x128xi1>
    %cst_12 = arith.constant 0xFF800000 : f32
    %21 = vector.broadcast %cst_12 : f32 to vector<8x128xf32>
    %22 = arith.select %15, %12, %21 : vector<8x128xi1>, vector<8x128xf32>
    %cst_13 = arith.constant dense<0xFF800000> : vector<8xf32>
    %23 = vector.multi_reduction <maximumf>, %22, %cst_13 [1] : vector<8x128xf32> to vector<8xf32>
    %24 = vector.shape_cast %23 : vector<8xf32> to vector<8x1xf32>
    %25 = vector.broadcast %24 : vector<8x1xf32> to vector<8x128xf32>
    %26 = arith.subf %12, %25 : vector<8x128xf32>
    %27 = math.exp %26 : vector<8x128xf32>
    %cst_14 = arith.constant 0.000000e+00 : f32
    %28 = vector.broadcast %cst_14 : f32 to vector<8x128xf32>
    %29 = arith.select %15, %27, %28 : vector<8x128xi1>, vector<8x128xf32>
    %cst_15 = arith.constant dense<0.000000e+00> : vector<8xf32>
    %30 = vector.multi_reduction <add>, %29, %cst_15 [1] : vector<8x128xf32> to vector<8xf32>
    %31 = vector.shape_cast %30 : vector<8xf32> to vector<8x1xf32>
    %32 = tpu.reciprocal %31 {approx = true} : vector<8x1xf32> -> vector<8x1xf32>
    %33 = vector.broadcast %32 : vector<8x1xf32> to vector<8x128xf32>
    %34 = arith.mulf %27, %33 : vector<8x128xf32>
    %35 = math.exp %12 : vector<8x128xf32>
    %36 = arith.select %20, %35, %12 : vector<8x128xi1>, vector<8x128xf32>
    %37 = arith.select %15, %34, %36 : vector<8x128xi1>, vector<8x128xf32>
    %c0_16 = arith.constant 0 : index
    %c0_17 = arith.constant 0 : index
    %38 = vector.load %arg6[%c0_16, %c0_17] : memref<8x128xf32, #tpu.memory_space<vmem>>, vector<8x128xf32>
    tpu.vector_store %arg6[%c0_16, %c0_17], %37 {strides = array<i32>} : memref<8x128xf32, #tpu.memory_space<vmem>>, vector<8x128xf32>,
    return
  }
  func.func @transform_0(%arg0: i32) -> (i32, i32) {
    %c0_i32 = arith.constant 0 : i32
    %c0_i32_0 = arith.constant 0 : i32
    return %arg0, %c0_i32 : i32, i32
  }
  func.func @transform_1(%arg0: i32) -> (i32, i32) {
    %c0_i32 = arith.constant 0 : i32
    %c0_i32_0 = arith.constant 0 : i32
    %c0_i32_1 = arith.constant 0 : i32
    return %c0_i32, %c0_i32_0 : i32, i32
  }
  func.func @transform_2(%arg0: i32) -> (i32, i32) {
    %c0_i32 = arith.constant 0 : i32
    %c0_i32_0 = arith.constant 0 : i32
    %c0_i32_1 = arith.constant 0 : i32
    return %c0_i32, %c0_i32_0 : i32, i32
  }
  func.func @transform_3(%arg0: i32) -> (i32, i32) {
    %c0_i32 = arith.constant 0 : i32
    %c0_i32_0 = arith.constant 0 : i32
    %c0_i32_1 = arith.constant 0 : i32
    return %c0_i32, %c0_i32_0 : i32, i32
  }
  func.func @transform_4(%arg0: i32) -> (i32, i32) {
    %c0_i32 = arith.constant 0 : i32
    %c0_i32_0 = arith.constant 0 : i32
    %c0_i32_1 = arith.constant 0 : i32
    return %c0_i32, %c0_i32_0 : i32, i32
  }
  func.func @transform_5(%arg0: i32) -> (i32, i32) {
    %c0_i32 = arith.constant 0 : i32
    %c0_i32_0 = arith.constant 0 : i32
    return %arg0, %c0_i32 : i32, i32
  }
}

</mosaic_0001>

<bundles_post_ra>
// kernel: tpu_custom_call.1
= control target key start
LH: loop header
LB: loop body
LE: loop exit
PB: predicated region body
PF: predicated region fallthrough
CT: control target
= control target key end

     0   :  { %10 = vsyncpa [#allocation3], 0  ;;  %s345_s0 = inlined_call_operand.hbm [shape: f32[8,16], index: 0, kind: input, shape index: {}]   ;;  %s346_s1 = inlined_call_operand.hbm [shape: f32[16,32], index: 1, kind: input, shape index: {}]   ;;  %s347_s2 = inlined_call_operand.vmem [shape: f32[1,32], index: 2, kind: input, shape index: {}]   ;;  %s348_s3 = inlined_call_operand.hbm [shape: f32[32,128], index: 3, kind: input, shape index: {}]   ;;  %s349_s4 = inlined_call_operand.vmem [shape: f32[1,128], index: 4, kind: input, shape index: {}]   ;;  %s350_s5 = inlined_call_operand.hbm [shape: f32[8,128], index: 5, kind: output, shape index: {}]  }
   0x1   :  { %11 = vsyncpa [#allocation6], 0  ;;  %s28_s20 = sshll.u32 %s346_s1, 4  ;;  %s29_s20 = int_to_ptr.hbm [resolvable:$true] %s28_s20 }
   0x2   :  { %12 = vsyncpa [#allocation4], 0  ;;  %s288_s21 = smov [#allocation5]   ;;  %s18_s25 = sshll.u32 %s345_s0, 4  ;;  %s19_s25 = int_to_ptr.hbm [resolvable:$true] %s18_s25 }
   0x3   :  { %s30_s22 = sshll.u32 %s288_s21, 4  ;;  %s289_s26 = smov 128   ;;  %s31_s22 = int_to_ptr.vmem [resolvable:$true] %s30_s22 }
   0x4   :  { %s290_s27 = smov 8   ;;  %s291_s28 = smov [#allocation2]  }
   0x5   :  { %36 = dma.hbm_to_vmem [thread:$0]  %s29_s20, 256, %s31_s22, [#allocation6], %s289_s26, %s289_s26, %s290_s27  }
   0x6   :  { %s20_s29 = sshll.u32 %s291_s28, 4  ;;  %s43_s7 = sshll.u32 %s348_s3, 4  ;;  %s21_s29 = int_to_ptr.vmem [resolvable:$true] %s20_s29  ;;  %s44_s7 = int_to_ptr.hbm [resolvable:$true] %s43_s7 }
   0x7   :  { %23 = dma.hbm_to_vmem [thread:$0]  %s19_s25, 128, %s21_s29, [#allocation3]  }
   0x8   :  { %s292_s1 = smov [#allocation7]  }
   0x9   :  { %s45_s8 = sshll.u32 %s292_s1, 4  ;;  %s46_s8 = int_to_ptr.vmem [resolvable:$true] %s45_s8 }
   0xa   :  { %51 = dma.hbm_to_vmem [thread:$0]  %s44_s7, 512, %s46_s8, [#allocation6], %s289_s26, %s289_s26, %s290_s27  }
   0xb   :  { %282 = dma.done.wait [#allocation3], 128  }
   0xc   :  { %283 = vsyncadd [#allocation3], 4294967168 }
   0xd   :  { %284 = dma.done.wait [#allocation6], 768  }
   0xe   :  { %285 = vsyncadd [#allocation6], 4294966528  ;;  %v68_v0 = vld [vmem:[#allocation5 + $0x8] sm:$0xff]  ;;  %v67_v1 = vld [vmem:[#allocation5] sm:$0xff]  ;;  %vm73_vm0 = vcmask 130048   ;;  %vm106_vm1 = vcmask 261120   ;;  %v130_v11 = vlaneseq }
   0xf   :  { %91 = vmatpush.msra.mxu0 %v68_v0  ;;  %v66_v2 = vld [vmem:[#allocation2] sm:$0xff]  ;;  %v101_v3 = vld [vmem:[#allocation7 + $0x18] sm:$0xff]  ;;  %v100_v4 = vld [vmem:[#allocation7 + $0x10] sm:$0xff]  ;;  %s159_s13 = sshll.u32 %s350_s5, 4  ;;  %s160_s13 = int_to_ptr.hbm [resolvable:$true] %s159_s13 }
  0x10   :  { %122 = vmatpush.msra.mxu1 %v101_v3  ;;  %v99_v5 = vld [vmem:[#allocation7 + $0x8] sm:$0xff]  ;;  %v98_v6 = vld [vmem:[#allocation7] sm:$0xff]  ;;  %v131_v12 = vand.u32 127, %v130_v11 }
  0x11   :  { %92 = vmatpush.msra.mxu0 %v67_v1  ;;  %v178_v7 = vld [vmem:[%s347_s2] ss:$0 sm:$0xff]  ;;  %s293_s2 = smov [#allocation8]  }
  0x12   :  { %170 = vmatmul.msk.f32.vlgmr.msra.gmra.mxu0 %vm73_vm0, %v66_v2  ;;  %123 = vmatpush.msra.mxu1 %v100_v4  ;;  %v179_v13 = vld [vmem:[%s349_s4] ss:$0 sm:$0xff]  ;;  %vm132_vm2 = vcmp.lt.s32.totalorder %v131_v12, 8  ;;  %vm133_vm3 = vcmp.ge.s32.totalorder %v131_v12, 8  ;;  %vm134_vm4 = vcmp.lt.s32.totalorder %v131_v12, 40  ;;  %s157_s4 = sshll.u32 %s293_s2, 4  ;;  %s158_s4 = int_to_ptr.vmem [resolvable:$true] %s157_s4 }
  0x13   :  { %vm135_vm5 = vmand %vm133_vm3, %vm134_vm4 }
  0x14   :  { %124 = vmatpush.msra.mxu1 %v99_v5 }
  0x16   :  { %125 = vmatpush.msra.mxu1 %v98_v6 }
  0x8f   :  { %v94_v8 = vpop.f32.mrf.mxu0 }
  0x90   :  { %v95_v9 = vadd.f32 %v178_v7, %v94_v8 }
  0x92   :  { %v97_v10 = vmax.f32 %v95_v9, 0.0 }
  0x94   :  { %171 = vmatmul.msk.f32.vlgmr.msra.gmra.mxu1 %vm106_vm1, %v97_v10 }
 0x111   :  { %v127_v14 = vpop.f32.mrf.mxu1 }
 0x112   :  { %v128_v15 = vadd.f32 %v179_v13, %v127_v14 }
 0x114   :  { %v136_v16 = vsel %vm132_vm2, %v128_v15, -inf  ;;  %v147_v22 = vmul.f32 1.442695, %v128_v15 }
 0x115   :  { %137 = vmax.xlane.f32.xlu0 %v136_v16 }
 0x188   :  { %v138_v17 = vpop.xlane.xlu0 %137 }
 0x189   :  { %v139_v18 = vsub.f32 %v128_v15, %v138_v17 }
 0x18b   :  { %v140_v19 = vmul.f32 1.442695, %v139_v18 }
 0x18d   :  { %180 = vpow2.f32 %v140_v19 }
 0x18e   :  { %182 = vpow2.f32 %v147_v22 }
 0x193   :  { %v181_v20 = vpop.eup %180 }
 0x194   :  { %v142_v21 = vsel %vm132_vm2, %v181_v20, 0.0  ;;  %v183_v24 = vpop.eup %182 }
 0x195   :  { %143 = vadd.xlane.f32.xlu0 %v142_v21  ;;  %v149_v27 = vsel %vm135_vm5, %v183_v24, %v128_v15 }
 0x208   :  { %v144_v23 = vpop.xlane.xlu0 %143 }
 0x209   :  { %184 = vrcp.f32 %v144_v23 }
 0x20f   :  { %v185_v25 = vpop.eup %184 }
 0x210   :  { %v146_v26 = vmul.f32 %v185_v25, %v181_v20 }
 0x212   :  { %v150_v28 = vsel %vm132_vm2, %v146_v26, %v149_v27 }
 0x213   :  { %151 = vst [vmem:[#allocation8] sm:$0xff] %v150_v28 }
 0x214   :  { %162 = dma.vmem_to_hbm [thread:$0]  %s158_s4, 128, %s160_s13, [#allocation4]  }
 0x215   :  { %286 = dma.done.wait [#allocation4], 128  }
 0x216   :  { %287 = vsyncadd [#allocation4], 4294967168 }
 0x217   :  { %167 = vsyncpa [#allocation3], 1 }
 0x218   :  { %168 = vsyncpa [#allocation6], 1 }
 0x219   :  { %169 = vsyncpa [#allocation4], 1 }

</bundles_post_ra>
